<compile_context>
chip_gen: v6e
topology: v6e:2x2x1
jax: 0.10.0
libtpu: 0.0.40
codegen_flags: <defaults>
</compile_context>

<pallas_src>
import functools
import math

import jax
import jax.numpy as jnp
from jax.experimental import pallas as pl
from jax.experimental.pallas import tpu as pltpu

_LANE = 128
_VMEM_BUDGET = 24 * 1024 * 1024   # tile sizing budget (fits v7x scoped VMEM)
_VMEM_LIMIT = 32 * 1024 * 1024    # scoped VMEM limit requested from Mosaic


def _round_up(n, m):
    return ((n + m - 1) // m) * m


def _pick_tiles(batch, input_size, x_itemsize):
    """Derive (tile_b, inner_b) from a VMEM budget and the batch size."""
    # Inner chunk: rows per MXU pass.  Small enough that the x/h1/h2 chunk
    # stays in vregs (no VMEM spill of intermediates); multiple of 16.
    inner_b = max(16, min(256, _round_up(batch, 16)))

    # Outer batch tile: as big as the VMEM budget allows.  The (tile_b, in) and
    # (tile_b, 1) blocks are lane-padded to 128 in VMEM and double-buffered.
    padded_in = _round_up(input_size, _LANE)
    bytes_per_row = 2 * padded_in * x_itemsize + 2 * _LANE * 4
    cap = max(inner_b, int(_VMEM_BUDGET // bytes_per_row))
    tile_b = min(8192, cap)

    if batch >= 2 * inner_b:
        # Keep at least two grid steps so the "parallel" batch axis can be
        # sharded across both TensorCores on v7x (no-op on v5e/v6e).
        tile_b = min(tile_b, _round_up((batch + 1) // 2, inner_b))
    else:
        tile_b = inner_b

    tile_b = max(inner_b, (tile_b // inner_b) * inner_b)
    return tile_b, inner_b


def _mlp_kernel(x_ref, w1_ref, b1_ref, w2_ref, b2_ref, w3_ref, b3_ref, o_ref,
                *, inner_b):
    # Weights/biases use constant index_maps -> DMA'd once, VMEM resident.
    # Load them once per grid step; they live in a handful of vregs.
    w1 = w1_ref[...]
    b1 = b1_ref[...]
    w2 = w2_ref[...]
    b2 = b2_ref[...]
    w3 = w3_ref[...]
    b3 = b3_ref[0]          # scalar bias from SMEM

    tile_b = x_ref.shape[0]
    n_chunks = tile_b // inner_b

    # Inner chunking keeps h1/h2 in registers while the outer grid tile stays
    # large enough to amortize per-grid-step DMA/bookkeeping overhead.
    @pl.loop(0, n_chunks)
    def _(c):
        r0 = pl.multiple_of(c * inner_b, inner_b)
        x = x_ref[pl.ds(r0, inner_b), :].astype(jnp.float32)

        # Layer 1: Linear(input_size -> 64) + ReLU (MXU matmul, f32 accumulate).
        h1 = jnp.dot(x, w1, preferred_element_type=jnp.float32) + b1
        h1 = jnp.maximum(h1, 0.0)

        # Layer 2: Linear(64 -> 32) + ReLU.
        h2 = jnp.dot(h1, w2, preferred_element_type=jnp.float32) + b2
        h2 = jnp.maximum(h2, 0.0)

        # Layer 3: Linear(32 -> 1).  N=1 would waste an MXU push; use the VPU
        # broadcast-multiply + lane reduction instead.
        y = jnp.sum(h2 * w3, axis=-1, keepdims=True) + b3
        o_ref[pl.ds(r0, inner_b), :] = y


def number_predictor(x, params, *, tile_b=None, inner_b=None):
    """x: (B, input_size) float32 (or bfloat16 from the producer).

    params: dict with w1 (in,64), b1 (1,64), w2 (64,32), b2 (1,32),
    w3 (1,32), b3 (1,) -- all float32 for parity with the fp32 module.
    Returns (B, 1) float32.
    """
    w1, b1 = params["w1"], params["b1"]
    w2, b2 = params["w2"], params["b2"]
    w3, b3 = params["w3"], params["b3"]

    B, input_size = x.shape
    itemsize = jnp.dtype(x.dtype).itemsize

    auto_tile, auto_inner = _pick_tiles(B, input_size, itemsize)
    if inner_b is None:
        inner_b = auto_inner if tile_b is None else math.gcd(auto_inner, tile_b)
    if tile_b is None:
        tile_b = max(inner_b, (auto_tile // inner_b) * inner_b)
    if inner_b % 8 != 0 or tile_b % inner_b != 0:
        raise ValueError("inner_b must be a multiple of 8 and divide tile_b")

    b_pad = _round_up(B, tile_b)
    if b_pad != B:
        x = jnp.pad(x, ((0, b_pad - B), (0, 0)))
    num_tiles = b_pad // tile_b

    # Advisory cost estimate so XLA can overlap this memory-bound call.
    flops = 2 * b_pad * (input_size * 64 + 64 * 32 + 32)
    weight_bytes = 4 * (input_size * 64 + 64 + 64 * 32 + 32 + 32 + 1)
    cost = pl.CostEstimate(
        flops=flops,
        transcendentals=0,
        bytes_accessed=b_pad * input_size * itemsize + b_pad * 4 + weight_bytes,
    )

    # Scoped VMEM: actual footprint (lane-padded, double-buffered) + headroom.
    padded_in = _round_up(input_size, _LANE)
    est_vmem = (2 * tile_b * padded_in * itemsize      # x blocks
                + 2 * tile_b * _LANE * 4               # out blocks
                + weight_bytes + 65536)
    vmem_limit = int(min(_VMEM_LIMIT, max(est_vmem + (4 << 20), 8 << 20)))

    out = pl.pallas_call(
        functools.partial(_mlp_kernel, inner_b=inner_b),
        out_shape=jax.ShapeDtypeStruct((b_pad, 1), jnp.float32),
        grid=(num_tiles,),
        in_specs=[
            # x: streamed per batch tile (double-buffered by the pipeline).
            pl.BlockSpec((tile_b, input_size), lambda i: (i, 0)),
            # Weights / biases: constant index_map -> DMA'd once, VMEM-resident.
            pl.BlockSpec((input_size, 64), lambda i: (0, 0)),   # w1
            pl.BlockSpec((1, 64), lambda i: (0, 0)),            # b1
            pl.BlockSpec((64, 32), lambda i: (0, 0)),           # w2
            pl.BlockSpec((1, 32), lambda i: (0, 0)),            # b2
            pl.BlockSpec((1, 32), lambda i: (0, 0)),            # w3 row
            pl.BlockSpec(memory_space=pltpu.MemorySpace.SMEM),  # b3 scalar
        ],
        out_specs=pl.BlockSpec((tile_b, 1), lambda i: (i, 0)),
        compiler_params=pltpu.CompilerParams(
            dimension_semantics=("parallel",),      # megacore split on v7x
            vmem_limit_bytes=vmem_limit,
        ),
        cost_estimate=cost,
    )(x, w1, b1, w2, b2, w3, b3)

    # NOTE: padded tail rows carry relu(b-propagated) garbage; this slice is
    # load-bearing and must not be removed.
    return out[:B]


def init_params(key, input_size):
    """Mirror nn.Linear default init (uniform +/- 1/sqrt(fan_in)), fp32.

    Layout chosen for the kernel (transposed w.r.t. PyTorch's (out, in)):
      w1: (input_size, 64)   b1: (1, 64)
      w2: (64, 32)           b2: (1, 32)
      w3: (1, 32)            b3: (1,)   (SMEM scalar)
    """
    def linear_init(k, fan_in, fan_out):
        kw, kb = jax.random.split(k)
        bound = 1.0 / jnp.sqrt(float(fan_in))
        w = jax.random.uniform(kw, (fan_in, fan_out), jnp.float32, -bound, bound)
        b = jax.random.uniform(kb, (1, fan_out), jnp.float32, -bound, bound)
        return w, b

    k1, k2, k3 = jax.random.split(key, 3)
    w1, b1 = linear_init(k1, input_size, 64)
    w2, b2 = linear_init(k2, 64, 32)
    w3, b3 = linear_init(k3, 32, 1)
    return {
        "w1": w1, "b1": b1,
        "w2": w2, "b2": b2,
        "w3": w3.reshape(1, 32), "b3": b3.reshape(1),
    }


def reference(x, p):
    """Pure-JAX fp32 reference matching the PyTorch module."""
    h1 = jnp.maximum(jnp.dot(x.astype(jnp.float32), p["w1"]) + p["b1"], 0.0)
    h2 = jnp.maximum(jnp.dot(h1, p["w2"]) + p["b2"], 0.0)
    return jnp.sum(h2 * p["w3"], axis=-1, keepdims=True) + p["b3"]


if __name__ == "__main__":
    key = jax.random.PRNGKey(0)
    k_params, k_x = jax.random.split(key)

    batch = 300          # ragged vs. the tile -> exercises padding + slice-back
    input_size = 32

    params = init_params(k_params, input_size)
    x = jax.random.normal(k_x, (batch, input_size), jnp.float32)

    # Explicit small tiles: 3 grid steps (last one partially padded), each
    # processed as 2 inner chunks of 64 rows.
    out = number_predictor(x, params, tile_b=128, inner_b=64)
    out = jax.block_until_ready(out)

    # Auto-derived tiling (the path large-batch callers would take).
    out_auto = jax.block_until_ready(number_predictor(x, params))

    ref = reference(x, params)
    assert out.shape == (batch, 1), out.shape
    assert jnp.allclose(out, ref, atol=2e-2, rtol=2e-2), "mismatch vs reference"
    assert jnp.allclose(out_auto, ref, atol=2e-2, rtol=2e-2), "auto-tile mismatch"

    print("KERNEL_OK")
</pallas_src>

<mosaic_0001>
module attributes {stable_mosaic.version = 11 : i64} {
  func.func @_mlp_kernel(%arg0: i32, %arg1: memref<128x32xf32, #tpu.memory_space<vmem>>, %arg2: memref<32x64xf32, #tpu.memory_space<vmem>>, %arg3: memref<1x64xf32, #tpu.memory_space<vmem>>, %arg4: memref<64x32xf32, #tpu.memory_space<vmem>>, %arg5: memref<1x32xf32, #tpu.memory_space<vmem>>, %arg6: memref<1x32xf32, #tpu.memory_space<vmem>>, %arg7: memref<1xf32, #tpu.memory_space<smem>>, %arg8: memref<128x1xf32, #tpu.memory_space<vmem>>) attributes {dimension_semantics = [#tpu.dimension_semantics<parallel>], iteration_bounds = array<i64: 3>, scalar_prefetch = 0 : i64, scratch_operands = 0 : i64, tpu.core_type = #tpu.core_type<tc>, window_params = [{transform_indices = @transform_0, window_bounds = array<i64: 128, 32>}, {pipeline_mode = #tpu.pipeline_mode<synchronous>, transform_indices = @transform_1, window_bounds = array<i64: 32, 64>}, {pipeline_mode = #tpu.pipeline_mode<synchronous>, transform_indices = @transform_2, window_bounds = array<i64: 1, 64>}, {pipeline_mode = #tpu.pipeline_mode<synchronous>, transform_indices = @transform_3, window_bounds = array<i64: 64, 32>}, {pipeline_mode = #tpu.pipeline_mode<synchronous>, transform_indices = @transform_4, window_bounds = array<i64: 1, 32>}, {pipeline_mode = #tpu.pipeline_mode<synchronous>, transform_indices = @transform_5, window_bounds = array<i64: 1, 32>}, {transform_indices = @transform_6, window_bounds = array<i64: 1>}, {transform_indices = @transform_7, window_bounds = array<i64: 128, 1>}]} {
    %c0 = arith.constant 0 : index
    %c0_0 = arith.constant 0 : index
    %0 = vector.load %arg2[%c0, %c0_0] : memref<32x64xf32, #tpu.memory_space<vmem>>, vector<32x64xf32>
    %c0_1 = arith.constant 0 : index
    %c0_2 = arith.constant 0 : index
    %1 = vector.load %arg3[%c0_1, %c0_2] : memref<1x64xf32, #tpu.memory_space<vmem>>, vector<1x64xf32>
    %c0_3 = arith.constant 0 : index
    %c0_4 = arith.constant 0 : index
    %2 = vector.load %arg4[%c0_3, %c0_4] : memref<64x32xf32, #tpu.memory_space<vmem>>, vector<64x32xf32>
    %c0_5 = arith.constant 0 : index
    %c0_6 = arith.constant 0 : index
    %3 = vector.load %arg5[%c0_5, %c0_6] : memref<1x32xf32, #tpu.memory_space<vmem>>, vector<1x32xf32>
    %c0_7 = arith.constant 0 : index
    %c0_8 = arith.constant 0 : index
    %4 = vector.load %arg6[%c0_7, %c0_8] : memref<1x32xf32, #tpu.memory_space<vmem>>, vector<1x32xf32>
    %c0_9 = arith.constant 0 : index
    %5 = memref.load %arg7[%c0_9] : memref<1xf32, #tpu.memory_space<smem>>
    %c0_i32 = arith.constant 0 : i32
    %c2_i32 = arith.constant 2 : i32
    %6 = arith.addi %c0_i32, %c2_i32 : i32
    %c1_i32 = arith.constant 1 : i32
    scf.for %arg9 = %c0_i32 to %6 step %c1_i32  : i32 {
      %c1_i32_11 = arith.constant 1 : i32
      %7 = arith.muli %arg9, %c1_i32_11 : i32
      %c0_i32_12 = arith.constant 0 : i32
      %8 = arith.addi %c0_i32_12, %7 : i32
      %c64_i32 = arith.constant 64 : i32
      %9 = arith.muli %8, %c64_i32 : i32
      %10 = tpu.assume_multiple %9, 64 : i32
      %11 = arith.index_cast %10 : i32 to index
      %c0_13 = arith.constant 0 : index
      %12 = vector.load %arg1[%11, %c0_13] : memref<128x32xf32, #tpu.memory_space<vmem>>, vector<64x32xf32>
      %cst = arith.constant dense<0.000000e+00> : vector<64x64xf32>
      %13 = tpu.matmul %12, %0, %cst {dimension_numbers = #tpu.dot_dimension_numbers<[1], [0], [0], [1], [0, 0, 1, 1], [], []>} : vector<64x32xf32>, vector<32x64xf32>, vector<64x64xf32> -> vector<64x64xf32>
      %14 = vector.broadcast %1 : vector<1x64xf32> to vector<64x64xf32>
      %15 = arith.addf %13, %14 : vector<64x64xf32>
      %cst_14 = arith.constant 0.000000e+00 : f32
      %16 = vector.broadcast %cst_14 : f32 to vector<64x64xf32>
      %17 = arith.maximumf %15, %16 : vector<64x64xf32>
      %cst_15 = arith.constant dense<0.000000e+00> : vector<64x32xf32>
      %18 = tpu.matmul %17, %2, %cst_15 {dimension_numbers = #tpu.dot_dimension_numbers<[1], [0], [0], [1], [0, 0, 1, 1], [], []>} : vector<64x64xf32>, vector<64x32xf32>, vector<64x32xf32> -> vector<64x32xf32>
      %19 = vector.broadcast %3 : vector<1x32xf32> to vector<64x32xf32>
      %20 = arith.addf %18, %19 : vector<64x32xf32>
      %cst_16 = arith.constant 0.000000e+00 : f32
      %21 = vector.broadcast %cst_16 : f32 to vector<64x32xf32>
      %22 = arith.maximumf %20, %21 : vector<64x32xf32>
      %23 = vector.broadcast %4 : vector<1x32xf32> to vector<64x32xf32>
      %24 = arith.mulf %22, %23 : vector<64x32xf32>
      %cst_17 = arith.constant dense<0.000000e+00> : vector<64xf32>
      %25 = vector.multi_reduction <add>, %24, %cst_17 [1] : vector<64x32xf32> to vector<64xf32>
      %26 = vector.shape_cast %25 : vector<64xf32> to vector<64x1xf32>
      %27 = vector.broadcast %5 : f32 to vector<64x1xf32>
      %28 = arith.addf %26, %27 : vector<64x1xf32>
      %29 = arith.index_cast %10 : i32 to index
      %c0_18 = arith.constant 0 : index
      %30 = vector.load %arg8[%29, %c0_18] : memref<128x1xf32, #tpu.memory_space<vmem>>, vector<64x1xf32>
      tpu.vector_store %arg8[%29, %c0_18], %28 {strides = array<i32>} : memref<128x1xf32, #tpu.memory_space<vmem>>, vector<64x1xf32>,
    }
    %c2_i32_10 = arith.constant 2 : i32
    return
  }
  func.func @transform_0(%arg0: i32) -> (i32, i32) {
    %c0_i32 = arith.constant 0 : i32
    %c0_i32_0 = arith.constant 0 : i32
    return %arg0, %c0_i32 : i32, i32
  }
  func.func @transform_1(%arg0: i32) -> (i32, i32) {
    %c0_i32 = arith.constant 0 : i32
    %c0_i32_0 = arith.constant 0 : i32
    %c0_i32_1 = arith.constant 0 : i32
    return %c0_i32, %c0_i32_0 : i32, i32
  }
  func.func @transform_2(%arg0: i32) -> (i32, i32) {
    %c0_i32 = arith.constant 0 : i32
    %c0_i32_0 = arith.constant 0 : i32
    %c0_i32_1 = arith.constant 0 : i32
    return %c0_i32, %c0_i32_0 : i32, i32
  }
  func.func @transform_3(%arg0: i32) -> (i32, i32) {
    %c0_i32 = arith.constant 0 : i32
    %c0_i32_0 = arith.constant 0 : i32
    %c0_i32_1 = arith.constant 0 : i32
    return %c0_i32, %c0_i32_0 : i32, i32
  }
  func.func @transform_4(%arg0: i32) -> (i32, i32) {
    %c0_i32 = arith.constant 0 : i32
    %c0_i32_0 = arith.constant 0 : i32
    %c0_i32_1 = arith.constant 0 : i32
    return %c0_i32, %c0_i32_0 : i32, i32
  }
  func.func @transform_5(%arg0: i32) -> (i32, i32) {
    %c0_i32 = arith.constant 0 : i32
    %c0_i32_0 = arith.constant 0 : i32
    %c0_i32_1 = arith.constant 0 : i32
    return %c0_i32, %c0_i32_0 : i32, i32
  }
  func.func @transform_6(%arg0: i32) -> i32 {
    %c0_i32 = arith.constant 0 : i32
    %c0_i32_0 = arith.constant 0 : i32
    return %c0_i32 : i32
  }
  func.func @transform_7(%arg0: i32) -> (i32, i32) {
    %c0_i32 = arith.constant 0 : i32
    %c0_i32_0 = arith.constant 0 : i32
    return %arg0, %c0_i32 : i32, i32
  }
}

</mosaic_0001>

<bundles_post_ra>
// kernel: tpu_custom_call.1
= control target key start
LH: loop header
LB: loop body
LE: loop exit
PB: predicated region body
PF: predicated region fallthrough
CT: control target
= control target key end

     0   :  { %s923_s26 = smov 0   ;;  %s1143_s0 = inlined_call_operand.vmem [shape: f32[384,32], index: 0, kind: input, shape index: {}]   ;;  %s1144_s1 = inlined_call_operand.vmem [shape: f32[32,64], index: 1, kind: input, shape index: {}]   ;;  %s1145_s2 = inlined_call_operand.vmem [shape: f32[1,64], index: 2, kind: input, shape index: {}]   ;;  %s1146_s3 = inlined_call_operand.vmem [shape: f32[64,32], index: 3, kind: input, shape index: {}]   ;;  %s1147_s4 = inlined_call_operand.vmem [shape: f32[1,32], index: 4, kind: input, shape index: {}]   ;;  %s1148_s5 = inlined_call_operand.vmem [shape: f32[1,32], index: 5, kind: input, shape index: {}]   ;;  %s1149_s6 = inlined_call_operand.<no memory space> [shape: f32[1], index: 6, kind: input, shape index: {}]   ;;  %s1150_s7 = inlined_call_operand.vmem [shape: f32[384,1], index: 7, kind: output, shape index: {}]  }
   0x1   :  { %12 = sst [smem:[#allocation2]] %s1149_s6 }
   0x2 LB: > { %s725_s27 = sadd.s32 4294967295, %s874_s26   ;;  %p729_p0 = scmp.ge.s32.totalorder %s874_s26, 1  ;;  %s874_s26 = sphi %s923_s26, %s18_s26  }
   0x3   : > { %p239_p1 = scmp.lt.s32.totalorder %s874_s26, 4 }
   0x5   : > { %p240_p2 = pnand %p729_p0, %p239_p1 }
   0x6   : > { %s730_s28 = sshll.u32 (!%p240_p2), %s725_s27, 4  ;;  %s946_s11 = sld [smem:[#allocation2]] (!%p240_p2) }
   0x7   : > { %243 = sbr.rel (%p240_p2) target bundleno = 583 (0x247), region = 48  ;;  %p272_p3 = scmp.lt.s32.totalorder (!%p240_p2), %s730_s28, 47 }
   0x8   : > { %s1018_s22 = smov (!%p240_p2), 0  }
   0xc   : > { %v934_v0 = vld [vmem:[%s1144_s1] sm:$0xff]  ;;  %v939_v1 = vld [vmem:[%s1144_s1 + $0x8] sm:$0xff]  ;;  %v944_v2 = vld [vmem:[%s1144_s1 + $0x10] sm:$0xff]  ;;  %s1152_s28 = smov (!%p272_p3, %s730_s28), 47 }
   0xd   : > { %v951_v3 = vld [vmem:[%s1144_s1 + $0x18] sm:$0xff]  ;;  %v956_v4 = vld [vmem:[%s1145_s2] ss:$0 sm:$0xff]  ;;  %v966_v6 = vld [vmem:[%s1146_s3 + $0x8] sm:$0xff]  ;;  %s731_s15 = sshll.u32 %s1152_s28, 3 }
   0xe   : > { %v961_v5 = vld [vmem:[%s1146_s3] sm:$0xff]  ;;  %v971_v7 = vld [vmem:[%s1146_s3 + $0x10] sm:$0xff]  ;;  %v976_v8 = vld [vmem:[%s1146_s3 + $0x18] sm:$0xff]  ;;  %s1011_s18 = scalar_lea.vmem %s1143_s0, %s731_s15  ;;  %s1016_s21 = scalar_lea.vmem %s1150_s7, %s731_s15 }
   0xf   : > { %v981_v9 = vld [vmem:[%s1146_s3 + $0x20] sm:$0xff]  ;;  %v986_v10 = vld [vmem:[%s1146_s3 + $0x28] sm:$0xff]  ;;  %v991_v11 = vld [vmem:[%s1146_s3 + $0x30] sm:$0xff] }
  0x10   : > { %v996_v12 = vld [vmem:[%s1146_s3 + $0x38] sm:$0xff]  ;;  %v1001_v13 = vld [vmem:[%s1147_s4] ss:$0 sm:$0xff] }
  0x11   : > { %v1006_v14 = vld [vmem:[%s1148_s5] ss:$0 sm:$0xff] }
  0x12 LB: >> { %784 = vmatprep.subr.mxu0 %v951_v3  ;;  %832 = vmatprep.subr.mxu1 %v996_v12  ;;  %s734_s28 = sshll.u32 %s878_s22, 6  ;;  %vm321_vm0 = vcmask 261120   ;;  %vm465_vm1 = vcmask 523264   ;;  %vm651_vm2 = vcmask 7168   ;;  %s304_s22 = sadd.s32 1, %s878_s22   ;;  %s878_s22 = sphi %s1018_s22, %s304_s22  }
  0x13   : >> { %785 = vmatpush3.msra.mxu0 %v951_v3  ;;  %840 = vmatpush3.msra.mxu1 %v996_v12  ;;  %s1034_s23 = scalar_lea.vmem %s1011_s18, %s734_s28  ;;  %s650_s24 = scalar_lea.vmem %s1016_s21, %s734_s28 }
  0x14   : >> { %786 = vmatprep.subr.mxu0 %v944_v2  ;;  %833 = vmatprep.subr.mxu1 %v991_v11  ;;  %v307_v15 = vld [vmem:[%s1034_s23] sm:$0xff]  ;;  %v308_v16 = vld [vmem:[%s1034_s23 + $0x8] sm:$0xff]  ;;  %v309_v17 = vld [vmem:[%s1034_s23 + $0x10] sm:$0xff]  ;;  %p301_p4 = scmp.ge.s32.totalorder %s304_s22, 2  }
  0x15   : >> { %787 = vmatpush3.msra.mxu0 %v944_v2  ;;  %841 = vmatpush3.msra.mxu1 %v991_v11  ;;  %v310_v18 = vld [vmem:[%s1034_s23 + $0x18] sm:$0xff]  ;;  %v311_v19 = vld [vmem:[%s1034_s23 + $0x20] sm:$0xff]  ;;  %v312_v20 = vld [vmem:[%s1034_s23 + $0x28] sm:$0xff] }
  0x16   : >> { %788 = vmatprep.subr.mxu0 %v939_v1  ;;  %834 = vmatprep.subr.mxu1 %v986_v10  ;;  %v313_v21 = vld [vmem:[%s1034_s23 + $0x30] sm:$0xff]  ;;  %v314_v22 = vld [vmem:[%s1034_s23 + $0x38] sm:$0xff] }
  0x17   : >> { %789 = vmatpush3.msra.mxu0 %v939_v1  ;;  %792 = vmatprep.mubr.msk.f32.mxu0 %vm321_vm0, %v307_v15 }
  0x18   : >> { %790 = vmatprep.subr.mxu0 %v934_v0  ;;  %842 = vmatpush3.msra.mxu1 %v986_v10 }
  0x19   : >> { %791 = vmatpush3.msra.mxu0 %v934_v0  ;;  %835 = vmatprep.subr.mxu1 %v981_v9 }
  0x1a   : >> { %793 = vmatmul.mubr.msk.f32.vlgmr.msra.gmra.mxu0 %vm321_vm0, %v308_v16  ;;  %804 = vmatprep.subr.mxu0 %v996_v12 }
  0x1b   : >> { %795 = vmatprep.mubr.msk.f32.mxu0 %vm321_vm0, %v309_v17  ;;  %805 = vmatpush3.msra.mxu0 %v996_v12 }
  0x1c   : >> { %806 = vmatprep.subr.mxu0 %v991_v11  ;;  %843 = vmatpush3.msra.mxu1 %v981_v9 }
  0x1d   : >> { %807 = vmatpush3.msra.mxu0 %v991_v11  ;;  %836 = vmatprep.subr.mxu1 %v976_v8 }
  0x1e   : >> { %796 = vmatmul.mubr.msk.f32.gmra.mxu0 %vm321_vm0, %v310_v18  ;;  %808 = vmatprep.subr.mxu0 %v986_v10 }
  0x1f   : >> { %798 = vmatprep.mubr.msk.f32.mxu0 %vm321_vm0, %v311_v19  ;;  %809 = vmatpush3.msra.mxu0 %v986_v10 }
  0x20   : >> { %810 = vmatprep.subr.mxu0 %v981_v9  ;;  %844 = vmatpush3.msra.mxu1 %v976_v8 }
  0x21   : >> { %811 = vmatpush3.msra.mxu0 %v981_v9  ;;  %837 = vmatprep.subr.mxu1 %v971_v7 }
  0x22   : >> { %799 = vmatmul.mubr.msk.f32.gmra.mxu0 %vm321_vm0, %v312_v20  ;;  %812 = vmatprep.subr.mxu0 %v976_v8 }
  0x23   : >> { %801 = vmatprep.mubr.msk.f32.mxu0 %vm321_vm0, %v313_v21  ;;  %813 = vmatpush3.msra.mxu0 %v976_v8 }
  0x24   : >> { %814 = vmatprep.subr.mxu0 %v971_v7  ;;  %845 = vmatpush3.msra.mxu1 %v971_v7 }
  0x25   : >> { %815 = vmatpush3.msra.mxu0 %v971_v7  ;;  %838 = vmatprep.subr.mxu1 %v966_v6 }
  0x26   : >> { %802 = vmatmul.mubr.msk.f32.gmra.mxu0 %vm321_vm0, %v314_v22  ;;  %816 = vmatprep.subr.mxu0 %v966_v6 }
  0x27   : >> { %817 = vmatpush3.msra.mxu0 %v966_v6  ;;  %846 = vmatpush3.msra.mxu1 %v966_v6 }
  0x28   : >> { %818 = vmatprep.subr.mxu0 %v961_v5  ;;  %839 = vmatprep.subr.mxu1 %v961_v5 }
  0x29   : >> { %819 = vmatpush3.msra.mxu0 %v961_v5  ;;  %847 = vmatpush3.msra.mxu1 %v961_v5 }
  0xda   : >> { %v794_v23 = vpop.f32.mrf.mxu0 }
  0xdb   : >> { %v418_v24 = vadd.f32 %v794_v23, %v956_v4 }
  0xdc   : >> { %v412_v25 = vpop.f32.mrf.mxu0 }
  0xdd   : >> { %v413_v26 = vadd.f32 %v956_v4, %v412_v25  ;;  %v452_v29 = vmax.f32 %v418_v24, 0.0 }
  0xde   : >> { %v797_v27 = vpop.f32.mrf.mxu0 }
  0xdf   : >> { %v451_v28 = vmax.f32 %v413_v26, 0.0  ;;  %v428_v30 = vadd.f32 %v797_v27, %v956_v4 }
  0xe0   : >> { %v422_v31 = vpop.f32.mrf.mxu0 }
  0xe1   : >> { %v423_v32 = vadd.f32 %v956_v4, %v422_v31  ;;  %820 = vmatprep.mubr.msk.f32.mxu0 %vm465_vm1, %v451_v28  ;;  %v454_v36 = vmax.f32 %v428_v30, 0.0 }
  0xe2   : >> { %v800_v33 = vpop.f32.mrf.mxu0  ;;  %821 = vmatmul.mubr.msk.f32.vlgmr.msra.gmra.mxu0 %vm465_vm1, %v452_v29 }
  0xe3   : >> { %v453_v34 = vmax.f32 %v423_v32, 0.0  ;;  %v438_v35 = vadd.f32 %v800_v33, %v956_v4 }
  0xe4   : >> { %v432_v37 = vpop.f32.mrf.mxu0 }
  0xe5   : >> { %v433_v38 = vadd.f32 %v956_v4, %v432_v37  ;;  %823 = vmatprep.mubr.msk.f32.mxu1 %vm465_vm1, %v453_v34  ;;  %v456_v39 = vmax.f32 %v438_v35, 0.0 }
  0xe6   : >> { %v803_v40 = vpop.f32.mrf.mxu0  ;;  %824 = vmatmul.mubr.msk.f32.vlgmr.msra.gmra.mxu1 %vm465_vm1, %v454_v36 }
  0xe7   : >> { %v455_v41 = vmax.f32 %v433_v38, 0.0  ;;  %v448_v42 = vadd.f32 %v803_v40, %v956_v4  ;;  %v641_v38 = vstv %s946_s11 }
  0xe8   : >> { %v442_v43 = vpop.f32.mrf.mxu0 }
  0xe9   : >> { %v443_v44 = vadd.f32 %v956_v4, %v442_v43  ;;  %826 = vmatprep.mubr.msk.f32.mxu1 %vm465_vm1, %v455_v41  ;;  %v458_v45 = vmax.f32 %v448_v42, 0.0 }
  0xea   : >> { %827 = vmatmul.mubr.msk.f32.gmra.mxu1 %vm465_vm1, %v456_v39 }
  0xeb   : >> { %v457_v46 = vmax.f32 %v443_v44, 0.0 }
  0xed   : >> { %829 = vmatprep.mubr.msk.f32.mxu1 %vm465_vm1, %v457_v46 }
  0xee   : >> { %830 = vmatmul.mubr.msk.f32.gmra.mxu1 %vm465_vm1, %v458_v45 }
 0x1a2   : >> { %v822_v47 = vpop.f32.mrf.mxu0 }
 0x1a3   : >> { %v562_v48 = vadd.f32 %v822_v47, %v1001_v13 }
 0x1a4   : >> { %v556_v49 = vpop.f32.mrf.mxu0 }
 0x1a5   : >> { %v596_v50 = vmax.f32 %v562_v48, 0.0  ;;  %v557_v51 = vadd.f32 %v1001_v13, %v556_v49 }
 0x1a6   : >> { %v825_v52 = vpop.f32.mrf.mxu1 }
 0x1a7   : >> { %v610_v53 = vmul.f32 %v1006_v14, %v596_v50  ;;  %v595_v54 = vmax.f32 %v557_v51, 0.0  ;;  %v572_v55 = vadd.f32 %v825_v52, %v1001_v13 }
 0x1a8   : >> { %v566_v56 = vpop.f32.mrf.mxu1 }
 0x1a9   : >> { %v609_v57 = vmul.f32 %v1006_v14, %v595_v54  ;;  %v598_v58 = vmax.f32 %v572_v55, 0.0  ;;  %v567_v59 = vadd.f32 %v1001_v13, %v566_v56  ;;  %v620_v60 = vsel %vm321_vm0, %v610_v53, 0.0 }
 0x1aa   : >> { %v828_v61 = vpop.f32.mrf.mxu1  ;;  %621 = vadd.xlane.f32.xlu0 %v620_v60 }
 0x1ab   : >> { %v612_v62 = vmul.f32 %v1006_v14, %v598_v58  ;;  %v597_v63 = vmax.f32 %v567_v59, 0.0  ;;  %v582_v15 = vadd.f32 %v828_v61, %v1001_v13  ;;  %v617_v17 = vsel %vm321_vm0, %v609_v57, 0.0 }
 0x1ac   : >> { %v576_v16 = vpop.f32.mrf.mxu1 }
 0x1ad   : >> { %v611_v18 = vmul.f32 %v1006_v14, %v597_v63  ;;  %v600_v19 = vmax.f32 %v582_v15, 0.0  ;;  %v577_v20 = vadd.f32 %v1001_v13, %v576_v16  ;;  %v626_v21 = vsel %vm321_vm0, %v612_v62, 0.0 }
 0x1ae   : >> { %627 = vadd.xlane.f32.xlu1 %v626_v21  ;;  %v831_v22 = vpop.f32.mrf.mxu1  ;;  %618 = vadd.xlane.f32.xlu0 %v617_v17 }
 0x1af   : >> { %v599_v23 = vmax.f32 %v577_v20, 0.0  ;;  %v592_v24 = vadd.f32 %v831_v22, %v1001_v13  ;;  %v614_v25 = vmul.f32 %v1006_v14, %v600_v19  ;;  %v623_v30 = vsel %vm321_vm0, %v611_v18, 0.0 }
 0x1b0   : >> { %v586_v26 = vpop.f32.mrf.mxu1 }
 0x1b1   : >> { %v613_v27 = vmul.f32 %v1006_v14, %v599_v23  ;;  %v602_v28 = vmax.f32 %v592_v24, 0.0  ;;  %v587_v29 = vadd.f32 %v1001_v13, %v586_v26  ;;  %v632_v35 = vsel %vm321_vm0, %v614_v25, 0.0 }
 0x1b2   : >> { %624 = vadd.xlane.f32.xlu1 %v623_v30 }
 0x1b3   : >> { %v601_v31 = vmax.f32 %v587_v29, 0.0  ;;  %v629_v32 = vsel %vm321_vm0, %v613_v27, 0.0  ;;  %v616_v33 = vmul.f32 %v1006_v14, %v602_v28 }
 0x1b4   : >> { %630 = vadd.xlane.f32.xlu0 %v629_v32 }
 0x1b5   : >> { %v615_v34 = vmul.f32 %v1006_v14, %v601_v31  ;;  %v638_v37 = vsel %vm321_vm0, %v616_v33, 0.0 }
 0x1b6   : >> { %633 = vadd.xlane.f32.xlu1 %v632_v35 }
 0x1b7   : >> { %v635_v36 = vsel %vm321_vm0, %v615_v34, 0.0 }
 0x1b8   : >> { %636 = vadd.xlane.f32.xlu0 %v635_v36 }
 0x1ba   : >> { %639 = vadd.xlane.f32.xlu1 %v638_v37 }
 0x233   : >> { %v622_v39 = vpop.xlane.xlu0 %621 }
 0x234   : >> { %v643_v40 = vadd.f32 %v641_v38, %v622_v39 }
 0x236   : >> { %653 = vst.msk [vmem:[%s650_s24 + $0x8] sm:$0xff] %vm651_vm2, %v643_v40 }
 0x237   : >> { %v628_v41 = vpop.xlane.xlu1 %627  ;;  %v619_v42 = vpop.xlane.xlu0 %618 }
 0x238   : >> { %v645_v43 = vadd.f32 %v641_v38, %v628_v41  ;;  %v642_v44 = vadd.f32 %v641_v38, %v619_v42 }
 0x23a   : >> { %655 = vst.msk [vmem:[%s650_s24 + $0x18] sm:$0xff] %vm651_vm2, %v645_v43  ;;  %652 = vst.msk [vmem:[%s650_s24] sm:$0xff] %vm651_vm2, %v642_v44 }
 0x23b   : >> { %v625_v45 = vpop.xlane.xlu1 %624 }
 0x23c   : >> { %v644_v46 = vadd.f32 %v641_v38, %v625_v45 }
 0x23d   : >> { %v631_v47 = vpop.xlane.xlu0 %630 }
 0x23e   : >> { %654 = vst.msk [vmem:[%s650_s24 + $0x10] sm:$0xff] %vm651_vm2, %v644_v46  ;;  %v646_v48 = vadd.f32 %v641_v38, %v631_v47 }
 0x23f   : >> { %v634_v49 = vpop.xlane.xlu1 %633 }
 0x240   : >> { %656 = vst.msk [vmem:[%s650_s24 + $0x20] sm:$0xff] %vm651_vm2, %v646_v48  ;;  %v647_v50 = vadd.f32 %v641_v38, %v634_v49 }
 0x241   : >> { %v637_v51 = vpop.xlane.xlu0 %636 }
 0x242   : >> { %657 = vst.msk [vmem:[%s650_s24 + $0x28] sm:$0xff] %vm651_vm2, %v647_v50  ;;  %v648_v52 = vadd.f32 %v641_v38, %v637_v51  ;;  %303 = sbr.rel (!%p301_p4) target bundleno = 18 (0x12), region = 87 }
 0x243   : >> { %v640_v53 = vpop.xlane.xlu1 %639 }
 0x244   : >> { %658 = vst.msk [vmem:[%s650_s24 + $0x30] sm:$0xff] %vm651_vm2, %v648_v52  ;;  %v649_v54 = vadd.f32 %v641_v38, %v640_v53 }
 0x246   : >> { %659 = vst.msk [vmem:[%s650_s24 + $0x38] sm:$0xff] %vm651_vm2, %v649_v54 }
 0x247 PF: > { %s18_s26 = sadd.s32 1, %s874_s26  }
 0x248   : > { %p15_p5 = scmp.ge.s32.totalorder %s18_s26, 5  }
 0x24a   :  { %17 = sbr.rel (!%p15_p5) target bundleno = 2 (0x2), region = 98 }

</bundles_post_ra>
